<compile_context>
chip_gen: v7x
topology: tpu7x:2x2x1
jax: 0.10.0
libtpu: 0.0.40
codegen_flags: <defaults>
</compile_context>

<pallas_src>
import math

import jax
import jax.numpy as jnp
from jax.experimental import pallas as pl
from jax.experimental.pallas import tpu as pltpu

_GELU_C = math.sqrt(2.0 / math.pi)


def _gated_gelu_f32(p1, p2):
    """NewGELU(p2) * p1, computed in f32."""
    p1 = p1.astype(jnp.float32)
    p2 = p2.astype(jnp.float32)
    inner = _GELU_C * (p2 + 0.044715 * (p2 * p2 * p2))
    return p1 * (0.5 * p2 * (1.0 + jnp.tanh(inner)))


def _gated_gelu_split_kernel(p1_ref, p2_ref, o_ref):
    # p1_ref, p2_ref, o_ref: (tm, tn) VMEM tiles (tn multiple of 128).
    o_ref[...] = _gated_gelu_f32(p1_ref[...], p2_ref[...]).astype(o_ref.dtype)


def _gated_gelu_fused_kernel(x_ref, o_ref):
    # Fallback for H not a multiple of 128: x_ref (tm, 2H), o_ref (tm, H).
    h = o_ref.shape[-1]
    o_ref[...] = _gated_gelu_f32(x_ref[:, :h], x_ref[:, h:]).astype(o_ref.dtype)


def _round_down(v, mult):
    return max(mult, (v // mult) * mult)


def vampnet_gated_gelu(x, *, vmem_budget_bytes=24 << 20):
    """x: (..., 2*hidden) -> (..., hidden), matching VampNetGatedGELU.forward."""
    *lead, two_h = x.shape
    assert two_h % 2 == 0, "last dim must be even for chunk(2, dim=-1)"
    h = two_h // 2
    m = 1
    for d in lead:
        m *= d
    x2d = x.reshape(m, two_h)

    itemsize = jnp.dtype(x.dtype).itemsize
    # sublane multiple: 8 for 32-bit, 16 for 16-bit, 32 for 8-bit dtypes.
    sub = 8 if itemsize >= 4 else (16 if itemsize == 2 else 32)

    compiler_kwargs = dict(vmem_limit_bytes=48 << 20)

    if h % 128 == 0:
        # ---- Lane-aligned fast path: split p1/p2 via two BlockSpecs and
        # ---- tile the hidden axis so per-step VMEM stays bounded.
        tn = 128
        for cand in (1024, 512, 256, 128):
            if h % cand == 0:
                tn = cand
                break
        n_h = h // tn  # number of hidden-axis blocks in one half

        # Live VMEM ~= 2 buffers x 3 streams (p1, p2, out) x tm x tn x bytes.
        max_tm = max(sub, vmem_budget_bytes // (6 * tn * itemsize))
        tm_target = min(1024, _round_down(max_tm, sub))
        tm = m if m <= tm_target else tm_target

        grid = (pl.cdiv(m, tm), n_h)
        out2d = pl.pallas_call(
            _gated_gelu_split_kernel,
            out_shape=jax.ShapeDtypeStruct((m, h), x.dtype),
            grid_spec=pltpu.PrefetchScalarGridSpec(
                num_scalar_prefetch=0,
                grid=grid,
                in_specs=[
                    # p1 half: columns [0, h)
                    pl.BlockSpec((tm, tn), lambda i, j: (i, j)),
                    # p2 half: columns [h, 2h)  -> block offset n_h
                    pl.BlockSpec((tm, tn), lambda i, j, _n=n_h: (i, j + _n)),
                ],
                out_specs=pl.BlockSpec((tm, tn), lambda i, j: (i, j)),
            ),
            compiler_params=pltpu.CompilerParams(
                dimension_semantics=("parallel", "parallel"),
                **compiler_kwargs,
            ),
        )(x2d, x2d)
    else:
        # ---- Fallback (H not a multiple of 128): full-width block, slice
        # ---- halves inside the kernel. Block last dims equal full array
        # ---- dims, so the (8,128) constraint is satisfied for any H.
        bytes_per_row = 3 * h * itemsize  # 2H in + H out
        max_tm = max(sub, vmem_budget_bytes // (2 * bytes_per_row))
        tm_target = min(1024, _round_down(max_tm, sub))
        tm = m if m <= tm_target else tm_target

        grid = (pl.cdiv(m, tm),)
        out2d = pl.pallas_call(
            _gated_gelu_fused_kernel,
            out_shape=jax.ShapeDtypeStruct((m, h), x.dtype),
            grid_spec=pltpu.PrefetchScalarGridSpec(
                num_scalar_prefetch=0,
                grid=grid,
                in_specs=[pl.BlockSpec((tm, two_h), lambda i: (i, 0))],
                out_specs=pl.BlockSpec((tm, h), lambda i: (i, 0)),
            ),
            compiler_params=pltpu.CompilerParams(
                dimension_semantics=("parallel",),
                **compiler_kwargs,
            ),
        )(x2d)

    return out2d.reshape(*lead, h)


def _reference(x):
    p1, p2 = jnp.split(x, 2, axis=-1)
    g = 0.5 * p2 * (1.0 + jnp.tanh(_GELU_C * (p2 + 0.044715 * jnp.power(p2, 3.0))))
    return p1 * g


if __name__ == "__main__":
    # Module has no parameters; only activations.
    key = jax.random.PRNGKey(0)
    k1, k2 = jax.random.split(key)

    # Lane-aligned path (hidden multiple of 128).
    batch, seq, hidden = 2, 8, 128
    x = jax.random.normal(k1, (batch, seq, 2 * hidden), dtype=jnp.float32)
    out = jax.block_until_ready(vampnet_gated_gelu(x))
    ref = _reference(x)
    assert out.shape == (batch, seq, hidden)
    assert jnp.allclose(out, ref, atol=1e-5, rtol=1e-5), "mismatch (aligned path)"

    # Fallback path (hidden not a multiple of 128).
    hidden_small = 32
    x_small = jax.random.normal(k2, (batch, seq, 2 * hidden_small), dtype=jnp.float32)
    out_small = jax.block_until_ready(vampnet_gated_gelu(x_small))
    ref_small = _reference(x_small)
    assert out_small.shape == (batch, seq, hidden_small)
    assert jnp.allclose(out_small, ref_small, atol=1e-5, rtol=1e-5), "mismatch (fallback path)"

    print("KERNEL_OK")
</pallas_src>

<mosaic_0001>
module attributes {stable_mosaic.version = 11 : i64} {
  func.func @_gated_gelu_split_kernel(%arg0: i32, %arg1: i32, %arg2: memref<16x128xf32, #tpu.memory_space<vmem>>, %arg3: memref<16x128xf32, #tpu.memory_space<vmem>>, %arg4: memref<16x128xf32, #tpu.memory_space<vmem>>) attributes {dimension_semantics = [#tpu.dimension_semantics<parallel>, #tpu.dimension_semantics<parallel>], iteration_bounds = array<i64: 1, 1>, scalar_prefetch = 0 : i64, scratch_operands = 0 : i64, tpu.core_type = #tpu.core_type<tc>, window_params = [{transform_indices = @transform_0, window_bounds = array<i64: 16, 128>}, {transform_indices = @transform_1, window_bounds = array<i64: 16, 128>}, {transform_indices = @transform_2, window_bounds = array<i64: 16, 128>}]} {
    %c0 = arith.constant 0 : index
    %c0_0 = arith.constant 0 : index
    %0 = vector.load %arg2[%c0, %c0_0] : memref<16x128xf32, #tpu.memory_space<vmem>>, vector<16x128xf32>
    %c0_1 = arith.constant 0 : index
    %c0_2 = arith.constant 0 : index
    %1 = vector.load %arg3[%c0_1, %c0_2] : memref<16x128xf32, #tpu.memory_space<vmem>>, vector<16x128xf32>
    %2 = arith.mulf %1, %1 : vector<16x128xf32>
    %3 = arith.mulf %2, %1 : vector<16x128xf32>
    %cst = arith.constant 4.471500e-02 : f32
    %4 = vector.broadcast %cst : f32 to vector<16x128xf32>
    %5 = arith.mulf %4, %3 : vector<16x128xf32>
    %6 = arith.addf %1, %5 : vector<16x128xf32>
    %cst_3 = arith.constant 0.797884583 : f32
    %7 = vector.broadcast %cst_3 : f32 to vector<16x128xf32>
    %8 = arith.mulf %7, %6 : vector<16x128xf32>
    %cst_4 = arith.constant 5.000000e-01 : f32
    %9 = vector.broadcast %cst_4 : f32 to vector<16x128xf32>
    %10 = arith.mulf %9, %1 : vector<16x128xf32>
    %11 = math.tanh %8 : vector<16x128xf32>
    %cst_5 = arith.constant 1.000000e+00 : f32
    %12 = vector.broadcast %cst_5 : f32 to vector<16x128xf32>
    %13 = arith.addf %12, %11 : vector<16x128xf32>
    %14 = arith.mulf %10, %13 : vector<16x128xf32>
    %15 = arith.mulf %0, %14 : vector<16x128xf32>
    %c0_6 = arith.constant 0 : index
    %c0_7 = arith.constant 0 : index
    %16 = vector.load %arg4[%c0_6, %c0_7] : memref<16x128xf32, #tpu.memory_space<vmem>>, vector<16x128xf32>
    tpu.vector_store %arg4[%c0_6, %c0_7], %15 {strides = array<i32>} : memref<16x128xf32, #tpu.memory_space<vmem>>, vector<16x128xf32>,
    return
  }
  func.func @transform_0(%arg0: i32, %arg1: i32) -> (i32, i32) {
    %c0_i32 = arith.constant 0 : i32
    return %arg0, %arg1 : i32, i32
  }
  func.func @transform_1(%arg0: i32, %arg1: i32) -> (i32, i32) {
    %c1_i32 = arith.constant 1 : i32
    %0 = arith.addi %arg1, %c1_i32 : i32
    %c0_i32 = arith.constant 0 : i32
    return %arg0, %0 : i32, i32
  }
  func.func @transform_2(%arg0: i32, %arg1: i32) -> (i32, i32) {
    %c0_i32 = arith.constant 0 : i32
    return %arg0, %arg1 : i32, i32
  }
}

</mosaic_0001>

<bundles_post_ra>
// kernel: tpu_custom_call.1
= control target key start
LH: loop header
LB: loop body
LE: loop exit
PB: predicated region body
PF: predicated region fallthrough
CT: control target
= control target key end

     0   :  { %7 = vsyncpa [#allocation3], 0  ;;  %s241_s0 = inlined_call_operand.hbm [shape: f32[16,256], index: 0, kind: input, shape index: {}]   ;;  %s242_s1 = inlined_call_operand.hbm [shape: f32[16,256], index: 1, kind: input, shape index: {}]   ;;  %s243_s2 = inlined_call_operand.hbm [shape: f32[16,128], index: 2, kind: output, shape index: {}]  }
   0x1   :  { %8 = vsyncpa [#allocation6], 0 }
   0x2   :  { %9 = vsyncpa [#allocation4], 0  ;;  %s174_s9 = smov [#allocation2]   ;;  %s99_s13 = scalar_lea.hbm %s241_s0, 256 }
   0x3   :  { %s15_s10 = sshll.u32 %s174_s9, 4  ;;  %p100_p0 = scmp.ne.s32.totalorder %s241_s0, %s99_s13  ;;  %s16_s10 = int_to_ptr.vmem [resolvable:$true] %s15_s10 }
   0x4   :  { %s101_s18 = scalar_lea.hbm %s241_s0, 512  ;;  %p103_p2 = scmp.lt.u32.totalorder %s99_s13, %s241_s0 }
   0x5   :  { %p102_p1 = scmp.lt.u32.totalorder %s101_s18, %s99_s13 }
   0x7   :  { %p104_p3 = por %p103_p2, %p102_p1 }
   0x9   :  { %p105_p4 = pnand %p104_p3, %p100_p0 }
   0xb   :  { %108 = shalt.err (!%p105_p4)
}
   0xc   :  { %s109_s21 = scalar_lea.vmem %s16_s10, 256  ;;  %p114_p6 = scmp.lt.s32.totalorder %s16_s10, %s16_s10 }
   0xd   :  { %p110_p5 = scmp.ne.s32.totalorder %s16_s10, %s109_s21  ;;  %p115_p7 = scmp.lt.s32.totalorder %s109_s21, %s109_s21 }
   0xf   :  { %p116_p8 = por %p115_p7, %p114_p6 }
  0x11   :  { %p117_p9 = pnand %p116_p8, %p110_p5 }
  0x13   :  { %120 = shalt.err (!%p117_p9)
}
  0x14   :  { %s175_s22 = smov 256   ;;  %s176_s23 = smov 128  }
  0x15   :  { %s177_s24 = smov 8   ;;  %s88_s29 = scalar_lea.hbm %s242_s1, 128 }
  0x16   :  { %21 = dma.hbm_to_vmem [thread:$0]  %s241_s0, 256, %s16_s10, [#allocation3], %s175_s22, %s176_s23, %s177_s24  }
  0x17   :  { %s178_s30 = smov [#allocation5]   ;;  %s145_s6 = scalar_lea.hbm %s242_s1, 384 }
  0x18   :  { %s30_s3 = sshll.u32 %s178_s30, 4  ;;  %p122_p10 = scmp.ne.s32.totalorder %s88_s29, %s145_s6  ;;  %s31_s3 = int_to_ptr.vmem [resolvable:$true] %s30_s3 }
  0x19   :  { %s123_s9 = scalar_lea.hbm %s242_s1, 512  ;;  %p124_p11 = scmp.lt.u32.totalorder %s88_s29, %s242_s1 }
  0x1a   :  { %p125_p12 = scmp.lt.u32.totalorder %s123_s9, %s145_s6  ;;  %p127_p0 = scmp.lt.u32.totalorder %s145_s6, %s88_s29 }
  0x1c   :  { %p126_p13 = por %p125_p12, %p124_p11 }
  0x1e   :  { %p128_p1 = por %p127_p0, %p126_p13 }
  0x20   :  { %p129_p2 = pnand %p128_p1, %p122_p10 }
  0x22   :  { %132 = shalt.err (!%p129_p2)
}
  0x23   :  { %s133_s0 = scalar_lea.vmem %s31_s3, 256  ;;  %p138_p4 = scmp.lt.s32.totalorder %s31_s3, %s31_s3 }
  0x24   :  { %p134_p3 = scmp.ne.s32.totalorder %s31_s3, %s133_s0  ;;  %p139_p5 = scmp.lt.s32.totalorder %s133_s0, %s133_s0 }
  0x26   :  { %p140_p6 = por %p139_p5, %p138_p4 }
  0x28   :  { %p141_p7 = pnand %p140_p6, %p134_p3 }
  0x2a   :  { %144 = shalt.err (!%p141_p7)
}
  0x2b   :  { %36 = dma.hbm_to_vmem [thread:$0]  %s88_s29, 256, %s31_s3, [#allocation6], %s175_s22, %s176_s23, %s177_s24  }
  0x2c   :  { %168 = dma.done.wait [#allocation3], 256  }
  0x2d   :  { %169 = vsyncadd [#allocation3], 4294967040 }
  0x2e   :  { %170 = dma.done.wait [#allocation6], 256  }
  0x2f   :  { %171 = vsyncadd [#allocation6], 4294967040  ;;  %v46_v0 = vld [vmem:[#allocation5] sm:$0xff]  ;;  %v47_v2 = vld [vmem:[#allocation5 + $0x8] sm:$0xff]  ;;  %s179_s1 = smov [#allocation7]  }
  0x30   :  { %v48_v1 = vmul.f32 %v46_v0, %v46_v0  ;;  %v49_v3 = vmul.f32 %v47_v2, %v47_v2  ;;  %v58_v12 = vmul.f32 0.5, %v46_v0  ;;  %v59_v14 = vmul.f32 0.5, %v47_v2  ;;  %v44_v17 = vld [vmem:[#allocation2] sm:$0xff]  ;;  %v45_v20 = vld [vmem:[#allocation2 + $0x8] sm:$0xff]  ;;  %s75_s10 = sshll.u32 %s179_s1, 4  ;;  %s76_s10 = int_to_ptr.vmem [resolvable:$true] %s75_s10 }
  0x31   :  { %s146_s13 = scalar_lea.vmem %s76_s10, 256  ;;  %p151_p9 = scmp.lt.s32.totalorder %s76_s10, %s76_s10 }
  0x32   :  { %v50_v4 = vmul.f32 %v48_v1, %v46_v0  ;;  %v51_v5 = vmul.f32 %v49_v3, %v47_v2  ;;  %p147_p8 = scmp.ne.s32.totalorder %s76_s10, %s146_s13  ;;  %p152_p10 = scmp.lt.s32.totalorder %s146_s13, %s146_s13 }
  0x34   :  { %v52_v6 = vmul.f32 0.044715, %v50_v4  ;;  %v53_v7 = vmul.f32 0.044715, %v51_v5  ;;  %p153_p11 = por %p152_p10, %p151_p9 }
  0x36   :  { %v54_v8 = vadd.f32 %v52_v6, %v46_v0  ;;  %v55_v9 = vadd.f32 %v53_v7, %v47_v2  ;;  %p154_p12 = pnand %p153_p11, %p147_p8 }
  0x38   :  { %v56_v10 = vmul.f32 0.7978846, %v54_v8  ;;  %v57_v11 = vmul.f32 0.7978846, %v55_v9 }
  0x3a   :  { %95 = vtanh.f32 %v56_v10 }
  0x3b   :  { %97 = vtanh.f32 %v57_v11 }
  0x44   :  { %v96_v13 = vpop.eup %95 }
  0x45   :  { %v98_v15 = vpop.eup %97  ;;  %v62_v16 = vadd.f32 1.0, %v96_v13 }
  0x46   :  { %v63_v18 = vadd.f32 1.0, %v98_v15 }
  0x47   :  { %v64_v19 = vmul.f32 %v62_v16, %v58_v12 }
  0x48   :  { %v65_v21 = vmul.f32 %v63_v18, %v59_v14 }
  0x49   :  { %v66_v22 = vmul.f32 %v64_v19, %v44_v17 }
  0x4a   :  { %v67_v23 = vmul.f32 %v65_v21, %v45_v20 }
  0x4b   :  { %68 = vst [vmem:[#allocation7] sm:$0xff] %v66_v22 }
  0x4c   :  { %69 = vst [vmem:[#allocation7 + $0x8] sm:$0xff] %v67_v23 }
  0x4d   :  { %157 = shalt.err (!%p154_p12)
}
  0x4e   :  { %s158_s16 = scalar_lea.hbm %s243_s2, 256 }
  0x4f   :  { %p159_p13 = scmp.ne.s32.totalorder %s243_s2, %s158_s16  ;;  %p162_p0 = scmp.lt.u32.totalorder %s158_s16, %s243_s2 }
  0x51   :  { %p164_p1 = pnand %p162_p0, %p159_p13 }
  0x53   :  { %167 = shalt.err (!%p164_p1)
}
  0x54   :  { %81 = dma.vmem_to_hbm [thread:$0]  %s76_s10, 256, %s243_s2, [#allocation4], %s176_s23, %s176_s23, %s177_s24  }
  0x55   :  { %172 = dma.done.wait [#allocation4], 256  }
  0x56   :  { %173 = vsyncadd [#allocation4], 4294967040 }
  0x57   :  { %85 = vsyncpa [#allocation3], 1 }
  0x58   :  { %86 = vsyncpa [#allocation6], 1 }
  0x59   :  { %87 = vsyncpa [#allocation4], 1 }

</bundles_post_ra>
